<compile_context>
chip_gen: v5e
topology: v5e:2x2
jax: 0.10.0
libtpu: 0.0.40
codegen_flags: <defaults>
</compile_context>

<pallas_src>
import jax
import jax.numpy as jnp
import numpy as np
from jax.experimental import pallas as pl
from jax.experimental.pallas import tpu as pltpu


def _pipeline_stage_kernel(x_ref, w_ref, b_ref, o_ref, h_ref):
    """One grid step == one pipeline stage applied to one batch tile.

    x_ref: (TM, H)   input tile (f32)
    w_ref: (1, H, H) this stage's weight (bf16)
    b_ref: (1, 1, H) this stage's bias (f32)
    o_ref: (TM, H)   output tile
    h_ref: (TM, H)   f32 VMEM scratch carrying the activation across stages
    """
    s = pl.program_id(1)
    last = pl.num_programs(1) - 1

    # First stage of this batch tile: load the input into the activation carry.
    @pl.when(s == 0)
    def _():
        h_ref[...] = x_ref[...].astype(jnp.float32)

    # bf16 MXU operands, f32 accumulation; bias add in f32 on the VPU.
    acc = jnp.dot(h_ref[...].astype(jnp.bfloat16), w_ref[0],
                  preferred_element_type=jnp.float32)
    acc = acc + b_ref[0]

    # ReLU between stages (not after the last), carry activation forward.
    @pl.when(s != last)
    def _():
        h_ref[...] = jnp.maximum(acc, 0.0)

    # Last stage: emit the output tile (output block is resident across s).
    @pl.when(s == last)
    def _():
        o_ref[...] = acc.astype(o_ref.dtype)


def _pick_m_tile(batch):
    # Prefer MXU-saturating tiles; fall back to the full batch (full-extent
    # block satisfies the (8,128) rule even for odd small batches).
    for cand in (256, 512, 128):
        if batch % cand == 0:
            return cand
    return batch


def distributed_pipeline_forward(x, weights, biases, chunks=1):
    """Forward of DistributedPipeline for a linear-stage pipeline graph.

    x:       [B, H]     input batch (the pipeline scatters it into `chunks`
                        micro-batches; row-wise stages make that a no-op for
                        forward numerics, so the kernel tiles M on its own)
    weights: [S, H, H]  per-stage weight (y = x @ W[s] + b[s]), any float dtype
    biases:  [S, 1, H]  per-stage bias
    chunks:  number of micro-batches (kept for API fidelity; forward-value
             equivalent for any positive value)
    """
    if int(chunks) <= 0:
        raise ValueError("number of chunks must be positive integer")
    B, H = x.shape
    S = weights.shape[0]

    tm = _pick_m_tile(B)
    m_tiles = B // tm

    # bf16 weights for the MXU (halves weight DMA + VMEM); f32 bias for accuracy.
    w_bf16 = weights.astype(jnp.bfloat16)
    b_f32 = biases.astype(jnp.float32)

    # Explicit VMEM budget (double-buffered per-stage weight + in/out tiles +
    # activation scratch), clamped under v7x's 64 MiB physical VMEM.
    est = (2 * H * H * 2              # weight double buffer (bf16)
           + 2 * tm * H * x.dtype.itemsize   # input tile double buffer
           + 2 * tm * H * x.dtype.itemsize   # output tile double buffer
           + tm * H * 4                      # activation scratch (f32)
           + 2 * H * 4)                      # bias double buffer
    vmem_limit = int(min(48 * 1024 * 1024, max(8 * 1024 * 1024, 2 * est)))

    out = pl.pallas_call(
        _pipeline_stage_kernel,
        out_shape=jax.ShapeDtypeStruct((B, H), x.dtype),
        grid_spec=pltpu.PrefetchScalarGridSpec(
            num_scalar_prefetch=0,
            grid=(m_tiles, S),  # (batch tile, pipeline stage)
            in_specs=[
                pl.BlockSpec((tm, H), lambda m, s: (m, 0)),      # input tile
                pl.BlockSpec((1, H, H), lambda m, s: (s, 0, 0)),  # stage weight
                pl.BlockSpec((1, 1, H), lambda m, s: (s, 0, 0)),  # stage bias
            ],
            out_specs=pl.BlockSpec((tm, H), lambda m, s: (m, 0)),
            scratch_shapes=[pltpu.VMEM((tm, H), jnp.float32)],   # activation carry
        ),
        compiler_params=pltpu.CompilerParams(
            dimension_semantics=("parallel", "arbitrary"),
            vmem_limit_bytes=vmem_limit,
        ),
    )(x, w_bf16, b_f32)
    return out


def _reference_forward(x, weights_bf16, biases, chunks):
    # Pure-JAX reference reproducing microbatch.scatter -> stages -> gather,
    # with the same bf16-operand / f32-accumulation matmul policy as the kernel.
    micro = jnp.split(x, chunks, axis=0)
    S = weights_bf16.shape[0]
    outs = []
    for m in micro:
        h = m.astype(jnp.float32)
        for s in range(S):
            h = jnp.dot(h.astype(jnp.bfloat16), weights_bf16[s],
                        preferred_element_type=jnp.float32)
            h = h + biases[s].astype(jnp.float32)
            if s < S - 1:
                h = jnp.maximum(h, 0.0)
        outs.append(h)
    return jnp.concatenate(outs, axis=0).astype(x.dtype)


if __name__ == "__main__":
    # batch=512 -> two 256-row M tiles (even count for v7x's 2 TCs, MXU-wide),
    # hidden=128 (lane-aligned), 3 pipeline stages, chunks=4 micro-batches
    # (checkpoint='except_last' does not change forward numerics).
    B, H, S, CHUNKS = 512, 128, 3, 4

    key = jax.random.PRNGKey(0)
    kx, kw, kb = jax.random.split(key, 3)
    x = jax.random.normal(kx, (B, H), dtype=jnp.float32)
    weights = jax.random.normal(kw, (S, H, H), dtype=jnp.float32) * (1.0 / np.sqrt(H))
    biases = jax.random.normal(kb, (S, 1, H), dtype=jnp.float32) * 0.1

    out = distributed_pipeline_forward(x, weights, biases, chunks=CHUNKS)
    out = jax.block_until_ready(out)

    ref = jax.block_until_ready(
        _reference_forward(x, weights.astype(jnp.bfloat16), biases, CHUNKS))
    np.testing.assert_allclose(np.asarray(out), np.asarray(ref), rtol=2e-2, atol=2e-2)

    print("KERNEL_OK")
</pallas_src>

<mosaic_0001>
module attributes {stable_mosaic.version = 11 : i64} {
  func.func @_pipeline_stage_kernel(%arg0: i32, %arg1: i32, %arg2: memref<256x128xf32, #tpu.memory_space<vmem>>, %arg3: memref<1x128x128xbf16, #tpu.memory_space<vmem>>, %arg4: memref<1x1x128xf32, #tpu.memory_space<vmem>>, %arg5: memref<256x128xf32, #tpu.memory_space<vmem>>, %arg6: memref<256x128xf32, #tpu.memory_space<vmem>>) attributes {dimension_semantics = [#tpu.dimension_semantics<parallel>, #tpu.dimension_semantics<arbitrary>], iteration_bounds = array<i64: 2, 3>, scalar_prefetch = 0 : i64, scratch_operands = 1 : i64, tpu.core_type = #tpu.core_type<tc>, window_params = [{transform_indices = @transform_0, window_bounds = array<i64: 256, 128>}, {transform_indices = @transform_1, window_bounds = array<i64: 1, 128, 128>}, {transform_indices = @transform_2, window_bounds = array<i64: 1, 1, 128>}, {transform_indices = @transform_3, window_bounds = array<i64: 256, 128>}]} {
    %c0_i32 = arith.constant 0 : i32
    %0 = arith.cmpi eq, %arg1, %c0_i32 : i32
    %1 = arith.extui %0 : i1 to i32
    %c0_i32_0 = arith.constant 0 : i32
    %2 = arith.cmpi ne, %1, %c0_i32_0 : i32
    scf.if %2 {
      %c0_11 = arith.constant 0 : index
      %c0_12 = arith.constant 0 : index
      %18 = vector.load %arg2[%c0_11, %c0_12] : memref<256x128xf32, #tpu.memory_space<vmem>>, vector<256x128xf32>
      %c0_13 = arith.constant 0 : index
      %c0_14 = arith.constant 0 : index
      %19 = vector.load %arg6[%c0_13, %c0_14] : memref<256x128xf32, #tpu.memory_space<vmem>>, vector<256x128xf32>
      tpu.vector_store %arg6[%c0_13, %c0_14], %18 {strides = array<i32>} : memref<256x128xf32, #tpu.memory_space<vmem>>, vector<256x128xf32>,
    } else {
    }
    %c0 = arith.constant 0 : index
    %c0_1 = arith.constant 0 : index
    %3 = vector.load %arg6[%c0, %c0_1] : memref<256x128xf32, #tpu.memory_space<vmem>>, vector<256x128xf32>
    %4 = arith.truncf %3 : vector<256x128xf32> to vector<256x128xbf16>
    %c0_2 = arith.constant 0 : index
    %c0_3 = arith.constant 0 : index
    %c0_4 = arith.constant 0 : index
    %5 = vector.load %arg3[%c0_2, %c0_3, %c0_4] : memref<1x128x128xbf16, #tpu.memory_space<vmem>>, vector<1x128x128xbf16>
    %6 = vector.shape_cast %5 : vector<1x128x128xbf16> to vector<128x128xbf16>
    %cst = arith.constant dense<0.000000e+00> : vector<256x128xf32>
    %7 = tpu.matmul %4, %6, %cst {dimension_numbers = #tpu.dot_dimension_numbers<[1], [0], [0], [1], [0, 0, 1, 1], [], []>} : vector<256x128xbf16>, vector<128x128xbf16>, vector<256x128xf32> -> vector<256x128xf32>
    %c0_5 = arith.constant 0 : index
    %c0_6 = arith.constant 0 : index
    %c0_7 = arith.constant 0 : index
    %8 = vector.load %arg4[%c0_5, %c0_6, %c0_7] : memref<1x1x128xf32, #tpu.memory_space<vmem>>, vector<1x1x128xf32>
    %9 = vector.shape_cast %8 : vector<1x1x128xf32> to vector<1x128xf32>
    %10 = vector.broadcast %9 : vector<1x128xf32> to vector<256x128xf32>
    %11 = arith.addf %7, %10 : vector<256x128xf32>
    %c2_i32 = arith.constant 2 : i32
    %12 = arith.cmpi ne, %arg1, %c2_i32 : i32
    %13 = arith.extui %12 : i1 to i32
    %c0_i32_8 = arith.constant 0 : i32
    %14 = arith.cmpi ne, %13, %c0_i32_8 : i32
    scf.if %14 {
      %cst_11 = arith.constant 0.000000e+00 : f32
      %18 = vector.broadcast %cst_11 : f32 to vector<256x128xf32>
      %19 = arith.maximumf %11, %18 : vector<256x128xf32>
      %c0_12 = arith.constant 0 : index
      %c0_13 = arith.constant 0 : index
      %20 = vector.load %arg6[%c0_12, %c0_13] : memref<256x128xf32, #tpu.memory_space<vmem>>, vector<256x128xf32>
      tpu.vector_store %arg6[%c0_12, %c0_13], %19 {strides = array<i32>} : memref<256x128xf32, #tpu.memory_space<vmem>>, vector<256x128xf32>,
    } else {
    }
    %c2_i32_9 = arith.constant 2 : i32
    %15 = arith.cmpi eq, %arg1, %c2_i32_9 : i32
    %16 = arith.extui %15 : i1 to i32
    %c0_i32_10 = arith.constant 0 : i32
    %17 = arith.cmpi ne, %16, %c0_i32_10 : i32
    scf.if %17 {
      %c0_11 = arith.constant 0 : index
      %c0_12 = arith.constant 0 : index
      %18 = vector.load %arg5[%c0_11, %c0_12] : memref<256x128xf32, #tpu.memory_space<vmem>>, vector<256x128xf32>
      tpu.vector_store %arg5[%c0_11, %c0_12], %11 {strides = array<i32>} : memref<256x128xf32, #tpu.memory_space<vmem>>, vector<256x128xf32>,
    } else {
    }
    return
  }
  func.func @transform_0(%arg0: i32, %arg1: i32) -> (i32, i32) {
    %c0_i32 = arith.constant 0 : i32
    %c0_i32_0 = arith.constant 0 : i32
    return %arg0, %c0_i32 : i32, i32
  }
  func.func @transform_1(%arg0: i32, %arg1: i32) -> (i32, i32, i32) {
    %c0_i32 = arith.constant 0 : i32
    %c0_i32_0 = arith.constant 0 : i32
    %c0_i32_1 = arith.constant 0 : i32
    return %arg1, %c0_i32, %c0_i32_0 : i32, i32, i32
  }
  func.func @transform_2(%arg0: i32, %arg1: i32) -> (i32, i32, i32) {
    %c0_i32 = arith.constant 0 : i32
    %c0_i32_0 = arith.constant 0 : i32
    %c0_i32_1 = arith.constant 0 : i32
    return %arg1, %c0_i32, %c0_i32_0 : i32, i32, i32
  }
  func.func @transform_3(%arg0: i32, %arg1: i32) -> (i32, i32) {
    %c0_i32 = arith.constant 0 : i32
    %c0_i32_0 = arith.constant 0 : i32
    return %arg0, %c0_i32 : i32, i32
  }
}

</mosaic_0001>

<bundles_post_ra>
// kernel: tpu_custom_call.1
= control target key start
LH: loop header
LB: loop body
LE: loop exit
PB: predicated region body
PF: predicated region fallthrough
CT: control target
= control target key end

     0   :  { %s1735_s0 = inlined_call_operand.hbm [shape: f32[512,128], index: 0, kind: input, shape index: {}]   ;;  %s1736_s1 = inlined_call_operand.hbm [shape: bf16[3,128,128], index: 1, kind: input, shape index: {}]   ;;  %s1737_s2 = inlined_call_operand.hbm [shape: f32[3,1,128], index: 2, kind: input, shape index: {}]   ;;  %s1738_s3 = inlined_call_operand.hbm [shape: f32[512,128], index: 3, kind: output, shape index: {}]  }
   0x1   :  { %1748 = sst [smem:[#allocation22_spill]] %s1736_s1 }
   0x2   :  { %1749 = sst [smem:[#allocation23_spill]] %s1738_s3 }
   0x3   :  { %8 = vsyncpa [#allocation4], 0 }
   0x4   :  { %10 = vsyncpa [#allocation4 + $0x1], 0 }
   0x5   :  { %11 = vsyncpa [#allocation7], 0 }
   0x6   :  { %13 = vsyncpa [#allocation7 + $0x1], 0 }
   0x7   :  { %14 = vsyncpa [#allocation5], 0 }
   0x8   :  { %16 = vsyncpa [#allocation5 + $0x1], 0  ;;  %s1247_s12 = smov 0   ;;  %s1249_s13 = smov 0  }
   0x9   :  { %s1251_s14 = smov 0   ;;  %s1253_s15 = smov 0  }
   0xa   :  { %s1255_s16 = smov 0   ;;  %s1257_s17 = smov 0  }
   0xb   :  { %s1259_s18 = smov 0   ;;  %s1261_s19 = smov 0  }
   0xc   :  { %s1263_s20 = smov 0   ;;  %s1265_s21 = smov 0  }
   0xd   :  { %s1267_s22 = smov 0  }
   0xe LB: > { %1750 = sst [smem:[#allocation13_spill]] %s1191_s15  ;;  %s1301_s23 = sadd.s32 4294967295, %s1219_s22   ;;  %s1219_s22 = sphi %s1267_s22, %s22_s22   ;;  %s1215_s21 = sphi %s1265_s21, %s1780_s21   ;;  %s1211_s20 = sphi %s1263_s20, %s1787_s20   ;;  %s1207_s19 = sphi %s1261_s19, %s1778_s19   ;;  %s1203_s18 = sphi %s1259_s18, %s1786_s18   ;;  %s1199_s17 = sphi %s1257_s17, %s1777_s17   ;;  %s1195_s16 = sphi %s1255_s16, %s1785_s16   ;;  %s1191_s15 = sphi %s1253_s15, %s1784_s15   ;;  %s1187_s14 = sphi %s1251_s14, %s1783_s14   ;;  %s1183_s13 = sphi %s1249_s13, %s1782_s13   ;;  %s1179_s12 = sphi %s1247_s12, %s1781_s12  }
   0xf   : > { %1751 = sst [smem:[#allocation14_spill]] %s1199_s17  ;;  %s31_s24 = sadd.s32 1, %s1211_s20 }
  0x10   : > { %1752 = sst [smem:[#allocation15_spill]] %s1207_s19  ;;  %p1304_p0 = scmp.ge.s32.totalorder %s31_s24, 3 }
  0x11   : > { %1753 = sst [smem:[#allocation16_spill]] %s1215_s21  ;;  %p49_p1 = scmp.eq.s32.totalorder %s1219_s22, 0 }
  0x12   : > { %p55_p2 = scmp.eq.s32.totalorder %s1301_s23, 0  ;;  %s67_s26 = sadd.s32 1, %s1187_s14 }
  0x13   : > { %s1789_s24 = smov (%p1304_p0, %s31_s24), 0  ;;  %p74_p3 = scmp.ne.s32.totalorder %s1187_s14, %s1183_s13 }
  0x14   : > { %1755 = sst [smem:[#allocation17_spill]] %s1789_s24  ;;  %p80_p4 = scmp.ne.s32.totalorder %s1183_s13, %s1179_s12 }
  0x15   : > { %s64_s27 = ssub.s32 %s1211_s20, %s1789_s24  ;;  %p1322_p6 = por %p74_p3, %p49_p1 }
  0x16   : > { %p65_p5 = scmp.eq.s32.totalorder %s64_s27, 0  ;;  %p1328_p7 = por %p80_p4, %p55_p2 }
  0x17   : > { %p1739_p8 = scmp.lt.s32.totalorder %s1219_s22, 6  ;;  %s178_s4 = sand.u32 1, %s1219_s22  }
  0x18   : > { %s1334_s30 = scalar_select %p65_p5, %s1187_s14, %s67_s26  }
  0x19   : > { %s1740_s5 = sand.u32 1, %s1187_s14   ;;  %s850_s7 = sshll.u32 %s1211_s20, 6 }
  0x1a   : > { %1758 = sst [smem:[#allocation18_spill]] %s1334_s30  ;;  %s802_s6 = sshll.u32 %s1740_s5, 6 }
  0x1b   : > { %s1759_s1 = sld [smem:[#allocation22_spill]]  ;;  %s182_s11 = scalar_lea.vmem [#allocation6], %s802_s6 }
  0x1c   : > { %s190_s12 = sshll.u32 %s182_s11, 4  ;;  %p1348_p9 = pnand %p1739_p8, %p1322_p6  ;;  %s191_s12 = int_to_ptr.vmem [resolvable:$true] %s190_s12 }
  0x1d   : > { %p805_p10 = scmp.ge.s32.totalorder %s1219_s22, 1  ;;  %s1353_s6 = scalar_lea.sflag [#allocation7], %s178_s4 }
  0x1e   : > { %s1222_s8 = smov 4   ;;  %p215_p11 = scmp.lt.s32.totalorder %s1219_s22, 7 }
  0x1f   : > { %s796_s9 = sadd.s32 4294967294, %s1219_s22   ;;  %s41_s4 = sadd.s32 1, %s1199_s17 }
  0x20   : > { %p1359_p12 = pnand %p805_p10, %p215_p11  ;;  %p48_p13 = scmp.ne.s32.totalorder %s1199_s17, %s1195_s16 }
  0x21   : > { %s187_s10 = scalar_lea.hbm %s1759_s1, %s850_s7  ;;  %s1221_s7 = smov 64  }
  0x22   : > { %s188_s26 = sshll.u32 %s187_s10, 4  ;;  %s34_s10 = sadd.s32 1, %s1215_s21  ;;  %s189_s26 = int_to_ptr.hbm [resolvable:$true] %s188_s26 }
  0x23   : > { %898 = dma.hbm_to_vmem [thread:$0]  (!%p1348_p9), %s189_s26, 1024, %s191_s12, %s1353_s6, %s1221_s7, %s1221_s7, %s1222_s8  }
  0x24   : > { %s1791_s10 = smov (!%p1304_p0, %s34_s10), %s1215_s21  ;;  %p54_p4 = scmp.ne.s32.totalorder %s1195_s16, %s1191_s15 }
  0x25   : > { %p36_p3 = scmp.ge.s32.totalorder %s1791_s10, 2  ;;  %p1375_p5 = por %p49_p1, %p48_p13 }
  0x26   : > { %p130_p6 = scmp.eq.s32.totalorder %s1301_s23, 5  ;;  %p1384_p10 = por %p55_p2, %p54_p4 }
  0x27   : > { %s1793_s10 = smov (%p36_p3, %s1791_s10), 0  ;;  %p136_p1 = scmp.eq.s32.totalorder %s796_s9, 5 }
  0x28   : > { %1763 = sst [smem:[#allocation19_spill]] %s1793_s10  ;;  %p1388_p0 = por %p130_p6, %p48_p13 }
  0x29   : > { %s38_s26 = ssub.s32 %s1215_s21, %s1793_s10  ;;  %s156_s7 = sand.u32 1, %s1199_s17  }
  0x2a   : > { %p39_p11 = scmp.eq.s32.totalorder %s38_s26, 0  ;;  %p1395_p8 = por %p136_p1, %p54_p4 }
  0x2b   : > { %s799_s1 = sshll.u32 %s156_s7, 8  ;;  %s849_s24 = sshll.u32 %s1215_s21, 8 }
  0x2c   : > { %s1766_s8 = scalar_select %p1395_p8, 1, 0 }
  0x2d   : > { %s1400_s5 = scalar_select %p39_p11, %s1199_s17, %s41_s4  }
  0x2e   : > { %1767 = sst [smem:[#allocation20_spill]] %s1766_s8  ;;  %s165_s3 = scalar_lea.hbm %s1735_s0, %s849_s24 }
  0x2f   : > { %1768 = sst [smem:[#allocation21_spill]] %s1400_s5  ;;  %s166_s19 = sshll.u32 %s165_s3, 4  ;;  %s167_s19 = int_to_ptr.hbm [resolvable:$true] %s166_s19 }
  0x30   : > { %s160_s10 = scalar_lea.vmem [#allocation3], %s799_s1  ;;  %p1769_p2 = scmp.lt.s32.totalorder %s1219_s22, 6 }
  0x31   : > { %s168_s9 = sshll.u32 %s160_s10, 4  ;;  %s206_s5 = scalar_lea.hbm %s1737_s2, %s1211_s20  ;;  %s169_s9 = int_to_ptr.vmem [resolvable:$true] %s168_s9 }
  0x32   : > { %p893_p13 = pnand %p1769_p2, %p1375_p5  ;;  %s157_s17 = scalar_lea.sflag [#allocation4], %s156_s7 }
  0x33   : > { %s1223_s21 = smov 128   ;;  %s1224_s8 = smov 8  }
  0x34   : > { %895 = dma.hbm_to_vmem [thread:$0]  (!%p893_p13), %s167_s19, 4096, %s169_s9, %s157_s17, %s1223_s21, %s1223_s21, %s1224_s8  }
  0x35   : > { %s208_s15 = sshll.u32 %s206_s5, 4  ;;  %s1770_s24 = sand.u32 1, %s1187_s14   ;;  %s209_s15 = int_to_ptr.hbm [resolvable:$true] %s208_s15 }
  0x36   : > { %s203_s3 = scalar_lea.vmem [#allocation8], %s1770_s24  ;;  %219 = sbr.rel (%p1359_p12) target bundleno = 422 (0x1a6), region = 32 }
  0x37   : > { %s210_s30 = sshll.u32 %s203_s3, 4  ;;  %s1422_s1 = sand.u32 (!%p1359_p12), 1, %s1195_s16   ;;  %s211_s30 = int_to_ptr.vmem [resolvable:$true] %s210_s30 }
  0x38   : > { %901 = dma.hbm_to_vmem [thread:$0]  (!%p1348_p9), %s209_s15, 16, %s211_s30, %s1353_s6  }
  0x39   : > { %s806_s10 = sshll.u32 (!%p1359_p12), %s1422_s1, 8  ;;  %s222_s11 = scalar_lea.sflag (!%p1359_p12), [#allocation4], %s1422_s1 }
  0x3a   : > { %s1426_s17 = scalar_lea.vmem (!%p1359_p12), [#allocation3], %s806_s10 }
  0x3b   : > { %1166 = dma.done.wait (%p1384_p10), %s222_s11, 4096  }
  0x3c   : > { %1168 = vsyncadd (%p1384_p10), %s222_s11, 4294963200  ;;  %s231_s19 = sand.u32 1, %s1301_s23   ;;  %s233_s21 = sand.u32 1, %s1183_s13  }
  0x3d   : > { %s807_s5 = sshll.u32 %s233_s21, 6  ;;  %s232_s27 = scalar_lea.sflag [#allocation7], %s231_s19 }
  0x3e   : > { %s1434_s6 = scalar_lea.vmem [#allocation6], %s807_s5 }
  0x3f   : > { %1170 = dma.done.wait (%p1328_p7), %s232_s27, 1040  }
  0x40   : > { %1172 = vsyncadd (%p1328_p7), %s232_s27, 4294966256  ;;  %s1440_s28 = scalar_lea.vmem [#allocation8], %s233_s21  ;;  %s1442_s7 = scalar_lea.vmem [#allocation9], %s806_s10 }
  0x41   : > { %p809_p9 = scmp.ne.s32.totalorder %s1203_s18, 0 }
  0x43   : > { %282 = sbr.rel (%p809_p9) target bundleno = 105 (0x69), region = 48 }
  0x48   : > { %v283_v0 = vld [vmem:[%s1426_s17] sm:$0xff]  ;;  %v284_v1 = vld [vmem:[%s1426_s17 + $0x8] sm:$0xff]  ;;  %v285_v2 = vld [vmem:[%s1426_s17 + $0x10] sm:$0xff] }
  0x49   : > { %315 = vst [vmem:[#allocation2 + $0xb0] sm:$0xff] %v283_v0  ;;  %v286_v3 = vld [vmem:[%s1426_s17 + $0x18] sm:$0xff]  ;;  %v287_v4 = vld [vmem:[%s1426_s17 + $0x20] sm:$0xff]  ;;  %v288_v5 = vld [vmem:[%s1426_s17 + $0x28] sm:$0xff] }
  0x4a   : > { %316 = vst [vmem:[#allocation2] sm:$0xff] %v284_v1  ;;  %v289_v6 = vld [vmem:[%s1426_s17 + $0x30] sm:$0xff]  ;;  %v290_v7 = vld [vmem:[%s1426_s17 + $0x38] sm:$0xff]  ;;  %v291_v8 = vld [vmem:[%s1426_s17 + $0x40] sm:$0xff] }
  0x4b   : > { %317 = vst [vmem:[#allocation2 + $0xd8] sm:$0xff] %v285_v2  ;;  %v292_v9 = vld [vmem:[%s1426_s17 + $0x48] sm:$0xff]  ;;  %v293_v10 = vld [vmem:[%s1426_s17 + $0x50] sm:$0xff]  ;;  %v294_v11 = vld [vmem:[%s1426_s17 + $0x58] sm:$0xff] }
  0x4c   : > { %318 = vst [vmem:[#allocation2 + $0x18] sm:$0xff] %v286_v3  ;;  %v295_v12 = vld [vmem:[%s1426_s17 + $0x60] sm:$0xff]  ;;  %v296_v13 = vld [vmem:[%s1426_s17 + $0x68] sm:$0xff]  ;;  %v297_v14 = vld [vmem:[%s1426_s17 + $0x70] sm:$0xff] }
  0x4d   : > { %319 = vst [vmem:[#allocation2 + $0x50] sm:$0xff] %v287_v4  ;;  %v298_v15 = vld [vmem:[%s1426_s17 + $0x78] sm:$0xff]  ;;  %v299_v16 = vld [vmem:[%s1426_s17 + $0x80] sm:$0xff]  ;;  %v300_v17 = vld [vmem:[%s1426_s17 + $0x88] sm:$0xff] }
  0x4e   : > { %320 = vst [vmem:[#allocation2 + $0x68] sm:$0xff] %v288_v5  ;;  %v301_v18 = vld [vmem:[%s1426_s17 + $0x90] sm:$0xff]  ;;  %v302_v19 = vld [vmem:[%s1426_s17 + $0x98] sm:$0xff]  ;;  %v303_v20 = vld [vmem:[%s1426_s17 + $0xa0] sm:$0xff] }
  0x4f   : > { %321 = vst [vmem:[#allocation2 + $0x30] sm:$0xff] %v289_v6  ;;  %v304_v21 = vld [vmem:[%s1426_s17 + $0xa8] sm:$0xff]  ;;  %v305_v22 = vld [vmem:[%s1426_s17 + $0xb0] sm:$0xff]  ;;  %v306_v23 = vld [vmem:[%s1426_s17 + $0xb8] sm:$0xff] }
  0x50   : > { %322 = vst [vmem:[#allocation2 + $0x48] sm:$0xff] %v290_v7  ;;  %v307_v24 = vld [vmem:[%s1426_s17 + $0xc0] sm:$0xff]  ;;  %v308_v25 = vld [vmem:[%s1426_s17 + $0xc8] sm:$0xff]  ;;  %v309_v26 = vld [vmem:[%s1426_s17 + $0xd0] sm:$0xff] }
  0x51   : > { %323 = vst [vmem:[#allocation2 + $0x80] sm:$0xff] %v291_v8  ;;  %v310_v27 = vld [vmem:[%s1426_s17 + $0xd8] sm:$0xff]  ;;  %v311_v28 = vld [vmem:[%s1426_s17 + $0xe0] sm:$0xff]  ;;  %v312_v29 = vld [vmem:[%s1426_s17 + $0xe8] sm:$0xff] }
  0x52   : > { %324 = vst [vmem:[#allocation2 + $0x88] sm:$0xff] %v292_v9  ;;  %v313_v30 = vld [vmem:[%s1426_s17 + $0xf0] sm:$0xff]  ;;  %v314_v31 = vld [vmem:[%s1426_s17 + $0xf8] sm:$0xff] }
  0x53   : > { %325 = vst [vmem:[#allocation2 + $0xe8] sm:$0xff] %v293_v10 }
  0x54   : > { %326 = vst [vmem:[#allocation2 + $0xb8] sm:$0xff] %v294_v11 }
  0x55   : > { %327 = vst [vmem:[#allocation2 + $0x60] sm:$0xff] %v295_v12 }
  0x56   : > { %328 = vst [vmem:[#allocation2 + $0xf0] sm:$0xff] %v296_v13 }
  0x57   : > { %329 = vst [vmem:[#allocation2 + $0x8] sm:$0xff] %v297_v14 }
  0x58   : > { %330 = vst [vmem:[#allocation2 + $0x78] sm:$0xff] %v298_v15 }
  0x59   : > { %331 = vst [vmem:[#allocation2 + $0x38] sm:$0xff] %v299_v16 }
  0x5a   : > { %332 = vst [vmem:[#allocation2 + $0x58] sm:$0xff] %v300_v17 }
  0x5b   : > { %333 = vst [vmem:[#allocation2 + $0x40] sm:$0xff] %v301_v18 }
  0x5c   : > { %334 = vst [vmem:[#allocation2 + $0xc8] sm:$0xff] %v302_v19 }
  0x5d   : > { %335 = vst [vmem:[#allocation2 + $0xe0] sm:$0xff] %v303_v20 }
  0x5e   : > { %336 = vst [vmem:[#allocation2 + $0x90] sm:$0xff] %v304_v21 }
  0x5f   : > { %337 = vst [vmem:[#allocation2 + $0x70] sm:$0xff] %v305_v22 }
  0x60   : > { %338 = vst [vmem:[#allocation2 + $0xc0] sm:$0xff] %v306_v23 }
  0x61   : > { %339 = vst [vmem:[#allocation2 + $0xa8] sm:$0xff] %v307_v24 }
  0x62   : > { %340 = vst [vmem:[#allocation2 + $0xd0] sm:$0xff] %v308_v25 }
  0x63   : > { %341 = vst [vmem:[#allocation2 + $0x10] sm:$0xff] %v309_v26 }
  0x64   : > { %342 = vst [vmem:[#allocation2 + $0x28] sm:$0xff] %v310_v27 }
  0x65   : > { %343 = vst [vmem:[#allocation2 + $0xa0] sm:$0xff] %v311_v28 }
  0x66   : > { %344 = vst [vmem:[#allocation2 + $0xf8] sm:$0xff] %v312_v29 }
  0x67   : > { %345 = vst [vmem:[#allocation2 + $0x20] sm:$0xff] %v313_v30 }
  0x68   : > { %346 = vst [vmem:[#allocation2 + $0x98] sm:$0xff] %v314_v31 }
  0x69 PF: > { %v858_v32 = vld [vmem:[%s1434_s6 + $0x38] sm:$0xff]  ;;  %v857_v33 = vld [vmem:[%s1434_s6 + $0x30] sm:$0xff]  ;;  %v856_v34 = vld [vmem:[%s1434_s6 + $0x28] sm:$0xff]  ;;  %p842_p7 = scmp.eq.s32.totalorder %s1203_s18, 2 }
  0x6a   : > { %463 = vmatpush.bf16.msra.mxu0 %v858_v32  ;;  %860 = vmatpush.bf16.msra.mxu1 %v858_v32  ;;  %v855_v35 = vld [vmem:[%s1434_s6 + $0x20] sm:$0xff]  ;;  %v854_v36 = vld [vmem:[%s1434_s6 + $0x18] sm:$0xff]  ;;  %v853_v37 = vld [vmem:[%s1434_s6 + $0x10] sm:$0xff] }
  0x6b   : > { %861 = vmatpush.bf16.msra.mxu2 %v858_v32  ;;  %862 = vmatpush.bf16.msra.mxu3 %v858_v32  ;;  %v852_v38 = vld [vmem:[%s1434_s6 + $0x8] sm:$0xff]  ;;  %v851_v39 = vld [vmem:[%s1434_s6] sm:$0xff]  ;;  %v347_v40 = vld [vmem:[#allocation2 + $0xb0] sm:$0xff] }
  0x6c   : > { %v348_v41 = vld [vmem:[#allocation2] sm:$0xff]  ;;  %v356_v43 = vld [vmem:[#allocation2 + $0x88] sm:$0xff]  ;;  %v363_v44 = vld [vmem:[#allocation2 + $0x38] sm:$0xff] }
  0x6d   : > { %v355_v42 = vld [vmem:[#allocation2 + $0x80] sm:$0xff]  ;;  %v364_v45 = vld [vmem:[#allocation2 + $0x58] sm:$0xff]  ;;  %v371_v46 = vld [vmem:[#allocation2 + $0xa8] sm:$0xff]  ;;  %v379_v48 = vpack.c.bf16 %v348_v41, %v347_v40 }
  0x6e   : > { %464 = vmatpush.bf16.msra.mxu0 %v857_v33  ;;  %863 = vmatpush.bf16.msra.mxu1 %v857_v33  ;;  %v372_v47 = vld [vmem:[#allocation2 + $0xd0] sm:$0xff]  ;;  %v383_v49 = vpack.c.bf16 %v356_v43, %v355_v42  ;;  %v387_v50 = vpack.c.bf16 %v364_v45, %v363_v44  ;;  %v349_v52 = vld [vmem:[#allocation2 + $0xd8] sm:$0xff]  ;;  %v357_v54 = vld [vmem:[#allocation2 + $0xe8] sm:$0xff] }
  0x6f   : > { %864 = vmatpush.bf16.msra.mxu2 %v857_v33  ;;  %865 = vmatpush.bf16.msra.mxu3 %v857_v33  ;;  %v391_v51 = vpack.c.bf16 %v372_v47, %v371_v46  ;;  %v350_v53 = vld [vmem:[#allocation2 + $0x18] sm:$0xff]  ;;  %v365_v56 = vld [vmem:[#allocation2 + $0x40] sm:$0xff]  ;;  %v366_v57 = vld [vmem:[#allocation2 + $0xc8] sm:$0xff] }
  0x70   : > { %v358_v55 = vld [vmem:[#allocation2 + $0xb8] sm:$0xff]  ;;  %v373_v58 = vld [vmem:[#allocation2 + $0x10] sm:$0xff]  ;;  %v374_v59 = vld [vmem:[#allocation2 + $0x28] sm:$0xff]  ;;  %v380_v60 = vpack.c.bf16 %v350_v53, %v349_v52  ;;  %v388_v62 = vpack.c.bf16 %v366_v57, %v365_v56 }
  0x71   : > { %v384_v61 = vpack.c.bf16 %v358_v55, %v357_v54  ;;  %v392_v63 = vpack.c.bf16 %v374_v59, %v373_v58  ;;  %v351_v0 = vld [vmem:[#allocation2 + $0x50] sm:$0xff]  ;;  %v352_v1 = vld [vmem:[#allocation2 + $0x68] sm:$0xff]  ;;  %v359_v2 = vld [vmem:[#allocation2 + $0x60] sm:$0xff] }
  0x72   : > { %465 = vmatpush.bf16.msra.mxu0 %v856_v34  ;;  %866 = vmatpush.bf16.msra.mxu1 %v856_v34  ;;  %v360_v3 = vld [vmem:[#allocation2 + $0xf0] sm:$0xff]  ;;  %v367_v4 = vld [vmem:[#allocation2 + $0xe0] sm:$0xff]  ;;  %v376_v7 = vld [vmem:[#allocation2 + $0xf8] sm:$0xff]  ;;  %v381_v8 = vpack.c.bf16 %v352_v1, %v351_v0 }
  0x73   : > { %867 = vmatpush.bf16.msra.mxu2 %v856_v34  ;;  %868 = vmatpush.bf16.msra.mxu3 %v856_v34  ;;  %v368_v5 = vld [vmem:[#allocation2 + $0x90] sm:$0xff]  ;;  %v375_v6 = vld [vmem:[#allocation2 + $0xa0] sm:$0xff]  ;;  %v385_v9 = vpack.c.bf16 %v360_v3, %v359_v2  ;;  %v354_v13 = vld [vmem:[#allocation2 + $0x48] sm:$0xff] }
  0x74   : > { %v389_v10 = vpack.c.bf16 %v368_v5, %v367_v4  ;;  %v393_v11 = vpack.c.bf16 %v376_v7, %v375_v6  ;;  %v353_v12 = vld [vmem:[#allocation2 + $0x30] sm:$0xff]  ;;  %v361_v14 = vld [vmem:[#allocation2 + $0x8] sm:$0xff]  ;;  %v362_v15 = vld [vmem:[#allocation2 + $0x78] sm:$0xff] }
  0x75   : > { %v369_v16 = vld [vmem:[#allocation2 + $0x70] sm:$0xff]  ;;  %v370_v17 = vld [vmem:[#allocation2 + $0xc0] sm:$0xff]  ;;  %v378_v19 = vld [vmem:[#allocation2 + $0x98] sm:$0xff]  ;;  %v382_v20 = vpack.c.bf16 %v354_v13, %v353_v12  ;;  %v386_v21 = vpack.c.bf16 %v362_v15, %v361_v14 }
  0x76   : > { %466 = vmatpush.bf16.msra.mxu0 %v855_v35  ;;  %869 = vmatpush.bf16.msra.mxu1 %v855_v35  ;;  %v377_v18 = vld [vmem:[#allocation2 + $0x20] sm:$0xff]  ;;  %v390_v22 = vpack.c.bf16 %v370_v17, %v369_v16 }
  0x77   : > { %870 = vmatpush.bf16.msra.mxu2 %v855_v35  ;;  %871 = vmatpush.bf16.msra.mxu3 %v855_v35  ;;  %v394_v23 = vpack.c.bf16 %v378_v19, %v377_v18  ;;  %v1486_v24 = vld [vmem:[%s1440_s28] ss:$0 sm:$0xff] }
  0x7a   : > { %467 = vmatpush.bf16.msra.mxu0 %v854_v36  ;;  %872 = vmatpush.bf16.msra.mxu1 %v854_v36 }
  0x7b   : > { %873 = vmatpush.bf16.msra.mxu2 %v854_v36  ;;  %874 = vmatpush.bf16.msra.mxu3 %v854_v36 }
  0x7e   : > { %468 = vmatpush.bf16.msra.mxu0 %v853_v37  ;;  %875 = vmatpush.bf16.msra.mxu1 %v853_v37 }
  0x7f   : > { %876 = vmatpush.bf16.msra.mxu2 %v853_v37  ;;  %877 = vmatpush.bf16.msra.mxu3 %v853_v37 }
  0x82   : > { %469 = vmatpush.bf16.msra.mxu0 %v852_v38  ;;  %878 = vmatpush.bf16.msra.mxu1 %v852_v38 }
  0x83   : > { %879 = vmatpush.bf16.msra.mxu2 %v852_v38  ;;  %880 = vmatpush.bf16.msra.mxu3 %v852_v38 }
  0x86   : > { %470 = vmatpush.bf16.msra.mxu0 %v851_v39  ;;  %881 = vmatpush.bf16.msra.mxu1 %v851_v39 }
  0x87   : > { %882 = vmatpush.bf16.msra.mxu2 %v851_v39  ;;  %883 = vmatpush.bf16.msra.mxu3 %v851_v39 }
  0x89   : > { %471 = vmatmul.bf16.vlgmr.msra.gmra.mxu0 %v379_v48  ;;  %491 = vmatmul.bf16.vlgmr.msra.gmra.mxu1 %v383_v49 }
  0x8a   : > { %511 = vmatmul.bf16.vlgmr.msra.gmra.mxu2 %v387_v50  ;;  %531 = vmatmul.bf16.vlgmr.msra.gmra.mxu3 %v391_v51 }
  0x99   : > { %476 = vmatmul.bf16.gmra.mxu0 %v380_v60  ;;  %496 = vmatmul.bf16.gmra.mxu1 %v384_v61 }
  0x9a   : > { %516 = vmatmul.bf16.gmra.mxu2 %v388_v62  ;;  %536 = vmatmul.bf16.gmra.mxu3 %v392_v63 }
  0xa9   : > { %481 = vmatmul.bf16.gmra.mxu0 %v381_v8  ;;  %501 = vmatmul.bf16.gmra.mxu1 %v385_v9 }
  0xaa   : > { %521 = vmatmul.bf16.gmra.mxu2 %v389_v10  ;;  %541 = vmatmul.bf16.gmra.mxu3 %v393_v11 }
  0xb9   : > { %486 = vmatmul.bf16.gmra.mxu0 %v382_v20  ;;  %506 = vmatmul.bf16.gmra.mxu1 %v386_v21 }
  0xba   : > { %526 = vmatmul.bf16.gmra.mxu2 %v390_v22  ;;  %546 = vmatmul.bf16.gmra.mxu3 %v394_v23 }
 0x106   : > { %v472_v25 = vpop.f32.mrf.mxu0  ;;  %v492_v26 = vpop.f32.mrf.mxu1 }
 0x107   : > { %v1489_v27 = vadd.f32 %v1486_v24, %v472_v25  ;;  %v1492_v28 = vadd.f32 %v1486_v24, %v492_v26 }
 0x10d   : > { %v512_v29 = vpop.f32.mrf.mxu2  ;;  %v532_v30 = vpop.f32.mrf.mxu3 }
 0x10e   : > { %v1495_v31 = vadd.f32 %v1486_v24, %v512_v29  ;;  %v1498_v32 = vadd.f32 %v1486_v24, %v532_v30  ;;  %v474_v33 = vpop.f32.mrf.mxu0  ;;  %v494_v34 = vpop.f32.mrf.mxu1 }
 0x10f   : > { %v1501_v35 = vadd.f32 %v1486_v24, %v474_v33  ;;  %v1504_v36 = vadd.f32 %v1486_v24, %v494_v34 }
 0x115   : > { %v514_v37 = vpop.f32.mrf.mxu2  ;;  %v534_v38 = vpop.f32.mrf.mxu3 }
 0x116   : > { %v1507_v39 = vadd.f32 %v1486_v24, %v514_v37  ;;  %v1510_v40 = vadd.f32 %v1486_v24, %v534_v38  ;;  %v477_v41 = vpop.f32.mrf.mxu0  ;;  %v497_v42 = vpop.f32.mrf.mxu1 }
 0x117   : > { %v1513_v43 = vadd.f32 %v1486_v24, %v477_v41  ;;  %v1516_v44 = vadd.f32 %v1486_v24, %v497_v42 }
 0x11d   : > { %v517_v45 = vpop.f32.mrf.mxu2  ;;  %v537_v46 = vpop.f32.mrf.mxu3 }
 0x11e   : > { %v1519_v47 = vadd.f32 %v1486_v24, %v517_v45  ;;  %v1522_v48 = vadd.f32 %v1486_v24, %v537_v46  ;;  %v479_v49 = vpop.f32.mrf.mxu0  ;;  %v499_v50 = vpop.f32.mrf.mxu1 }
 0x11f   : > { %v1525_v51 = vadd.f32 %v1486_v24, %v479_v49  ;;  %v1528_v52 = vadd.f32 %v1486_v24, %v499_v50 }
 0x125   : > { %v519_v53 = vpop.f32.mrf.mxu2  ;;  %v539_v54 = vpop.f32.mrf.mxu3 }
 0x126   : > { %v1531_v55 = vadd.f32 %v1486_v24, %v519_v53  ;;  %v1534_v56 = vadd.f32 %v1486_v24, %v539_v54  ;;  %v482_v57 = vpop.f32.mrf.mxu0  ;;  %v502_v58 = vpop.f32.mrf.mxu1 }
 0x127   : > { %v1537_v59 = vadd.f32 %v1486_v24, %v482_v57  ;;  %v1540_v60 = vadd.f32 %v1486_v24, %v502_v58 }
 0x12d   : > { %v522_v61 = vpop.f32.mrf.mxu2  ;;  %v542_v62 = vpop.f32.mrf.mxu3 }
 0x12e   : > { %v1543_v63 = vadd.f32 %v1486_v24, %v522_v61  ;;  %v1546_v0 = vadd.f32 %v1486_v24, %v542_v62  ;;  %v484_v1 = vpop.f32.mrf.mxu0  ;;  %v504_v2 = vpop.f32.mrf.mxu1 }
 0x12f   : > { %v1549_v3 = vadd.f32 %v1486_v24, %v484_v1  ;;  %v1552_v4 = vadd.f32 %v1486_v24, %v504_v2 }
 0x135   : > { %v524_v5 = vpop.f32.mrf.mxu2  ;;  %v544_v6 = vpop.f32.mrf.mxu3 }
 0x136   : > { %v1555_v7 = vadd.f32 %v1486_v24, %v524_v5  ;;  %v1558_v8 = vadd.f32 %v1486_v24, %v544_v6  ;;  %v487_v9 = vpop.f32.mrf.mxu0  ;;  %v507_v10 = vpop.f32.mrf.mxu1 }
 0x137   : > { %v1561_v11 = vadd.f32 %v1486_v24, %v487_v9  ;;  %v1564_v12 = vadd.f32 %v1486_v24, %v507_v10 }
 0x13d   : > { %v527_v13 = vpop.f32.mrf.mxu2  ;;  %v547_v14 = vpop.f32.mrf.mxu3 }
 0x13e   : > { %v1567_v15 = vadd.f32 %v1486_v24, %v527_v13  ;;  %v1570_v16 = vadd.f32 %v1486_v24, %v547_v14  ;;  %v489_v17 = vpop.f32.mrf.mxu0  ;;  %v509_v18 = vpop.f32.mrf.mxu1 }
 0x13f   : > { %v1573_v19 = vadd.f32 %v1486_v24, %v489_v17  ;;  %v1576_v20 = vadd.f32 %v1486_v24, %v509_v18 }
 0x142   : > { %555 = sbr.rel (%p842_p7) target bundleno = 361 (0x169), region = 52 }
 0x145   : > { %v529_v21 = vpop.f32.mrf.mxu2  ;;  %v549_v22 = vpop.f32.mrf.mxu3 }
 0x146   : > { %v1579_v23 = vadd.f32 %v1486_v24, %v529_v21  ;;  %v1582_v25 = vadd.f32 %v1486_v24, %v549_v22 }
 0x147   : > { %v556_v26 = vmax.f32 %v1489_v27, 0.0  ;;  %v557_v29 = vmax.f32 %v1501_v35, 0.0  ;;  %v558_v30 = vmax.f32 %v1513_v43, 0.0  ;;  %v559_v33 = vmax.f32 %v1525_v51, 0.0 }
 0x148   : > { %v560_v34 = vmax.f32 %v1537_v59, 0.0  ;;  %v561_v37 = vmax.f32 %v1549_v3, 0.0  ;;  %v562_v24 = vmax.f32 %v1561_v11, 0.0  ;;  %v563_v38 = vmax.f32 %v1573_v19, 0.0 }
 0x149   : > { %588 = vst [vmem:[#allocation2 + $0xb0] sm:$0xff] %v556_v26  ;;  %v564_v41 = vmax.f32 %v1492_v28, 0.0  ;;  %v565_v42 = vmax.f32 %v1504_v36, 0.0  ;;  %v566_v45 = vmax.f32 %v1516_v44, 0.0  ;;  %v567_v46 = vmax.f32 %v1528_v52, 0.0 }
 0x14a   : > { %589 = vst [vmem:[#allocation2] sm:$0xff] %v557_v29  ;;  %v568_v49 = vmax.f32 %v1540_v60, 0.0  ;;  %v569_v50 = vmax.f32 %v1552_v4, 0.0  ;;  %v570_v53 = vmax.f32 %v1564_v12, 0.0  ;;  %v571_v54 = vmax.f32 %v1576_v20, 0.0 }
 0x14b   : > { %590 = vst [vmem:[#allocation2 + $0xd8] sm:$0xff] %v558_v30  ;;  %v572_v57 = vmax.f32 %v1495_v31, 0.0  ;;  %v573_v58 = vmax.f32 %v1507_v39, 0.0  ;;  %v574_v61 = vmax.f32 %v1519_v47, 0.0  ;;  %v575_v62 = vmax.f32 %v1531_v55, 0.0 }
 0x14c   : > { %591 = vst [vmem:[#allocation2 + $0x18] sm:$0xff] %v559_v33  ;;  %v576_v1 = vmax.f32 %v1543_v63, 0.0  ;;  %v577_v2 = vmax.f32 %v1555_v7, 0.0  ;;  %v578_v5 = vmax.f32 %v1567_v15, 0.0  ;;  %v579_v6 = vmax.f32 %v1579_v23, 0.0 }
 0x14d   : > { %592 = vst [vmem:[#allocation2 + $0x50] sm:$0xff] %v560_v34  ;;  %v580_v9 = vmax.f32 %v1498_v32, 0.0  ;;  %v581_v10 = vmax.f32 %v1510_v40, 0.0  ;;  %v582_v13 = vmax.f32 %v1522_v48, 0.0  ;;  %v583_v14 = vmax.f32 %v1534_v56, 0.0 }
 0x14e   : > { %593 = vst [vmem:[#allocation2 + $0x68] sm:$0xff] %v561_v37  ;;  %v584_v17 = vmax.f32 %v1546_v0, 0.0  ;;  %v585_v18 = vmax.f32 %v1558_v8, 0.0  ;;  %v586_v21 = vmax.f32 %v1570_v16, 0.0  ;;  %v587_v22 = vmax.f32 %v1582_v25, 0.0 }
 0x14f   : > { %594 = vst [vmem:[#allocation2 + $0x30] sm:$0xff] %v562_v24 }
 0x150   : > { %595 = vst [vmem:[#allocation2 + $0x48] sm:$0xff] %v563_v38 }
 0x151   : > { %596 = vst [vmem:[#allocation2 + $0x80] sm:$0xff] %v564_v41 }
 0x152   : > { %597 = vst [vmem:[#allocation2 + $0x88] sm:$0xff] %v565_v42 }
 0x153   : > { %598 = vst [vmem:[#allocation2 + $0xe8] sm:$0xff] %v566_v45 }
 0x154   : > { %599 = vst [vmem:[#allocation2 + $0xb8] sm:$0xff] %v567_v46 }
 0x155   : > { %600 = vst [vmem:[#allocation2 + $0x60] sm:$0xff] %v568_v49 }
 0x156   : > { %601 = vst [vmem:[#allocation2 + $0xf0] sm:$0xff] %v569_v50 }
 0x157   : > { %602 = vst [vmem:[#allocation2 + $0x8] sm:$0xff] %v570_v53 }
 0x158   : > { %603 = vst [vmem:[#allocation2 + $0x78] sm:$0xff] %v571_v54 }
 0x159   : > { %604 = vst [vmem:[#allocation2 + $0x38] sm:$0xff] %v572_v57 }
 0x15a   : > { %605 = vst [vmem:[#allocation2 + $0x58] sm:$0xff] %v573_v58 }
 0x15b   : > { %606 = vst [vmem:[#allocation2 + $0x40] sm:$0xff] %v574_v61 }
 0x15c   : > { %607 = vst [vmem:[#allocation2 + $0xc8] sm:$0xff] %v575_v62 }
 0x15d   : > { %608 = vst [vmem:[#allocation2 + $0xe0] sm:$0xff] %v576_v1 }
 0x15e   : > { %609 = vst [vmem:[#allocation2 + $0x90] sm:$0xff] %v577_v2 }
 0x15f   : > { %610 = vst [vmem:[#allocation2 + $0x70] sm:$0xff] %v578_v5 }
 0x160   : > { %611 = vst [vmem:[#allocation2 + $0xc0] sm:$0xff] %v579_v6 }
 0x161   : > { %612 = vst [vmem:[#allocation2 + $0xa8] sm:$0xff] %v580_v9 }
 0x162   : > { %613 = vst [vmem:[#allocation2 + $0xd0] sm:$0xff] %v581_v10 }
 0x163   : > { %614 = vst [vmem:[#allocation2 + $0x10] sm:$0xff] %v582_v13 }
 0x164   : > { %615 = vst [vmem:[#allocation2 + $0x28] sm:$0xff] %v583_v14 }
 0x165   : > { %616 = vst [vmem:[#allocation2 + $0xa0] sm:$0xff] %v584_v17 }
 0x166   : > { %617 = vst [vmem:[#allocation2 + $0xf8] sm:$0xff] %v585_v18 }
 0x167   : > { %618 = vst [vmem:[#allocation2 + $0x20] sm:$0xff] %v586_v21 }
 0x168   : > { %619 = vst [vmem:[#allocation2 + $0x98] sm:$0xff] %v587_v22 }
 0x169 PF: > { %p843_p12 = scmp.ne.s32.totalorder %s1203_s18, 2 }
 0x16b   : > { %623 = sbr.rel (%p843_p12) target bundleno = 400 (0x190), region = 56 }
 0x170   : > { %624 = vst [vmem:[%s1442_s7] sm:$0xff] %v1489_v27 }
 0x171   : > { %625 = vst [vmem:[%s1442_s7 + $0x8] sm:$0xff] %v1501_v35 }
 0x172   : > { %626 = vst [vmem:[%s1442_s7 + $0x10] sm:$0xff] %v1513_v43 }
 0x173   : > { %627 = vst [vmem:[%s1442_s7 + $0x18] sm:$0xff] %v1525_v51 }
 0x174   : > { %628 = vst [vmem:[%s1442_s7 + $0x20] sm:$0xff] %v1537_v59 }
 0x175   : > { %629 = vst [vmem:[%s1442_s7 + $0x28] sm:$0xff] %v1549_v3 }
 0x176   : > { %630 = vst [vmem:[%s1442_s7 + $0x30] sm:$0xff] %v1561_v11 }
 0x177   : > { %631 = vst [vmem:[%s1442_s7 + $0x38] sm:$0xff] %v1573_v19 }
 0x178   : > { %632 = vst [vmem:[%s1442_s7 + $0x40] sm:$0xff] %v1492_v28 }
 0x179   : > { %633 = vst [vmem:[%s1442_s7 + $0x48] sm:$0xff] %v1504_v36 }
 0x17a   : > { %634 = vst [vmem:[%s1442_s7 + $0x50] sm:$0xff] %v1516_v44 }
 0x17b   : > { %635 = vst [vmem:[%s1442_s7 + $0x58] sm:$0xff] %v1528_v52 }
 0x17c   : > { %636 = vst [vmem:[%s1442_s7 + $0x60] sm:$0xff] %v1540_v60 }
 0x17d   : > { %637 = vst [vmem:[%s1442_s7 + $0x68] sm:$0xff] %v1552_v4 }
 0x17e   : > { %638 = vst [vmem:[%s1442_s7 + $0x70] sm:$0xff] %v1564_v12 }
 0x17f   : > { %639 = vst [vmem:[%s1442_s7 + $0x78] sm:$0xff] %v1576_v20 }
 0x180   : > { %640 = vst [vmem:[%s1442_s7 + $0x80] sm:$0xff] %v1495_v31 }
 0x181   : > { %641 = vst [vmem:[%s1442_s7 + $0x88] sm:$0xff] %v1507_v39 }
 0x182   : > { %642 = vst [vmem:[%s1442_s7 + $0x90] sm:$0xff] %v1519_v47 }
 0x183   : > { %643 = vst [vmem:[%s1442_s7 + $0x98] sm:$0xff] %v1531_v55 }
 0x184   : > { %644 = vst [vmem:[%s1442_s7 + $0xa0] sm:$0xff] %v1543_v63 }
 0x185   : > { %645 = vst [vmem:[%s1442_s7 + $0xa8] sm:$0xff] %v1555_v7 }
 0x186   : > { %646 = vst [vmem:[%s1442_s7 + $0xb0] sm:$0xff] %v1567_v15 }
 0x187   : > { %647 = vst [vmem:[%s1442_s7 + $0xb8] sm:$0xff] %v1579_v23 }
 0x188   : > { %648 = vst [vmem:[%s1442_s7 + $0xc0] sm:$0xff] %v1498_v32 }
 0x189   : > { %649 = vst [vmem:[%s1442_s7 + $0xc8] sm:$0xff] %v1510_v40 }
 0x18a   : > { %650 = vst [vmem:[%s1442_s7 + $0xd0] sm:$0xff] %v1522_v48 }
 0x18b   : > { %651 = vst [vmem:[%s1442_s7 + $0xd8] sm:$0xff] %v1534_v56 }
 0x18c   : > { %652 = vst [vmem:[%s1442_s7 + $0xe0] sm:$0xff] %v1546_v0 }
 0x18d   : > { %653 = vst [vmem:[%s1442_s7 + $0xe8] sm:$0xff] %v1558_v8 }
 0x18e   : > { %654 = vst [vmem:[%s1442_s7 + $0xf0] sm:$0xff] %v1570_v16 }
 0x18f   : > { %655 = vst [vmem:[%s1442_s7 + $0xf8] sm:$0xff] %v1582_v25 }
 0x190 PF: > { %s1771_s18 = sld [smem:[#allocation15_spill]]  ;;  %s669_s26 = sshll.u32 %s1442_s7, 4  ;;  %s670_s26 = int_to_ptr.vmem [resolvable:$true] %s669_s26 }
 0x191   : > { %s1772_s8 = sld [smem:[#allocation23_spill]]  ;;  %s657_s15 = scalar_lea.sflag [#allocation5], %s1422_s1 }
 0x196   : > { %s859_s23 = sshll.u32 %s1771_s18, 8 }
 0x197   : > { %s668_s9 = scalar_lea.hbm %s1772_s8, %s859_s23  ;;  %s1113_s11 = scalar_lea.hbm %s1772_s8, 512 }
 0x198   : > { %s671_s4 = sshll.u32 %s668_s9, 4  ;;  %s672_s4 = int_to_ptr.hbm [resolvable:$true] %s671_s4 }
 0x199   : > { %s1107_s24 = sshra.s32 %s672_s4, 4  ;;  %s1108_s24 = int_to_ptr.hbm [resolvable:$true] %s1107_s24 }
 0x19a   : > { %s1109_s3 = scalar_lea.hbm %s1108_s24, 256  ;;  %p1114_p6 = scmp.lt.s32.totalorder %s1108_s24, %s1772_s8 }
 0x19b   : > { %p1110_p3 = scmp.ne.s32.totalorder %s1108_s24, %s1109_s3  ;;  %p1115_p10 = scmp.lt.s32.totalorder %s1113_s11, %s1109_s3 }
 0x19d   : > { %p1111_p4 = pnand %p1110_p3, %p1388_p0  ;;  %p1116_p1 = por %p1115_p10, %p1114_p6 }
 0x19f   : > { %p1112_p5 = pneg %p1111_p4 }
 0x1a1   : > { %p1117_p11 = pnand %p1116_p1, %p1112_p5 }
 0x1a3   : > { %1120 = shalt.err (!%p1117_p11)
}
 0x1a4   : > { %s1225_s1 = smov 128   ;;  %s1226_s21 = smov 8  }
 0x1a5   : > { %890 = dma.vmem_to_hbm [thread:$0]  (%p1388_p0), %s670_s26, 4096, %s672_s4, %s657_s15, %s1225_s1, %s1225_s1, %s1226_s21  }
 0x1a6 PF: > { %s1773_s5 = sld [smem:[#allocation13_spill]]  ;;  %p907_p2 = scmp.ge.s32.totalorder %s1219_s22, 2 }
 0x1a8   : > { %p903_p13 = pnand %p907_p2, %p1395_p8 }
 0x1aa   : > { %p904_p9 = pneg %p903_p13 }
 0x1ac   : > { %s686_s6 = sand.u32 1, %s1773_s5  }
 0x1ad   : > { %s687_s28 = scalar_lea.sflag [#allocation5], %s686_s6 }
 0x1ae   : > { %1174 = dma.done.wait (%p904_p9), %s687_s28, 4096  }
 0x1af   : > { %1176 = vsyncadd (%p904_p9), %s687_s28, 4294963200  ;;  %s22_s22 = sadd.s32 1, %s1219_s22   ;;  %s1775_s7 = sld [smem:[#allocation18_spill]] }
 0x1b0   : > { %p19_p7 = scmp.ge.s32.totalorder %s22_s22, 8   ;;  %s1776_s25 = sld [smem:[#allocation14_spill]] }
 0x1b1   : > { %s1777_s17 = sld [smem:[#allocation21_spill]]  ;;  %s1781_s12 = smov %s1183_s13 }
 0x1b2   : > { %s1778_s19 = sld [smem:[#allocation16_spill]]  ;;  %s1782_s13 = smov %s1187_s14 }
 0x1b3   : > { %s1779_s23 = sld [smem:[#allocation17_spill]]  ;;  %s1784_s15 = smov %s1195_s16 }
 0x1b4   : > { %s1780_s21 = sld [smem:[#allocation19_spill]]  ;;  %s1786_s18 = smov %s1211_s20 }
 0x1b5   : > { %s1783_s14 = smov %s1775_s7  ;;  %21 = sbr.rel (!%p19_p7) target bundleno = 14 (0xe), region = 113 }
 0x1b6   : > { %s1785_s16 = smov %s1776_s25 }
 0x1b9   : > { %s1787_s20 = smov %s1779_s23 }
 0x1ba   :  { %693 = vsyncpa [#allocation4], 1 }
 0x1bb   :  { %695 = vsyncpa [#allocation4 + $0x1], 1 }
 0x1bc   :  { %696 = vsyncpa [#allocation7], 1 }
 0x1bd   :  { %698 = vsyncpa [#allocation7 + $0x1], 1 }
 0x1be   :  { %699 = vsyncpa [#allocation5], 1 }
 0x1bf   :  { %701 = vsyncpa [#allocation5 + $0x1], 1 }

</bundles_post_ra>
